<compile_context>
chip_gen: v5e
topology: v5e:2x2
jax: 0.10.0
libtpu: 0.0.40
codegen_flags: <defaults>
</compile_context>

<pallas_src>
import numpy as np

import jax
import jax.numpy as jnp
from jax.experimental import pallas as pl
from jax.experimental.pallas import tpu as pltpu

# constant.LReLu_negative_slope is not given in the snippet; ASFFNet uses 0.2.
LRELU_NEG_SLOPE = 0.2


# ----------------------------------------------------------------------------
# Layout / parameter packing helpers (plain JAX / numpy, run once at trace time)
# ----------------------------------------------------------------------------
def _choose_row_packing(H, WC):
    """Pick G = image rows per packed compute row so that the lane width
    L = G*WC is a multiple of 128, preferring sublane counts divisible by 8."""
    candidates = [g for g in range(1, H + 1)
                  if H % g == 0 and (g * WC) % 128 == 0]
    for g in candidates:
        if (H // g) % 8 == 0:
            return g
    return candidates[0] if candidates else 1


def _pack_params(w_oikk, b, W, C, k, dil, pad, G, q_list, mxu_dtype):
    """Fold the width taps, zero padding and the G-row packing of a dilated
    conv into one (len(q_list)*G*W*C, G*W*C) matrix plus an L-wide bias row.

    Row index    = q_idx*L + h_in*W*C + j_in*C + ci   (matches LHS lanes)
    Column index =           h_out*W*C + j_out*C + co (matches output lanes)
    """
    kk = k * k
    n_q = len(q_list)
    q_index = {q: i for i, q in enumerate(q_list)}

    # Static routing tensor: which (q, h_in, j_in) feeds which (h_out, j_out)
    # through which kernel tap.  Out-of-range j_in entries are simply absent,
    # which implements the W-direction zero padding with no lane masks.
    route = np.zeros((n_q, G, W, G, W, kk), dtype=np.float32)
    for ky in range(k):
        o = ky * dil - pad                       # vertical tap offset (image rows)
        for kx in range(k):
            dxo = kx * dil - pad                 # horizontal tap offset
            for h_out in range(G):
                h_in = (h_out + o) % G
                qi = q_index[(h_out + o) // G]
                for j_out in range(W):
                    j_in = j_out + dxo
                    if 0 <= j_in < W:
                        route[qi, h_in, j_in, h_out, j_out, ky * k + kx] = 1.0

    # (Cout, Cin, kh, kw) -> (kh, kw, Cin, Cout) -> (tap, Cin, Cout)
    w_taps = jnp.transpose(w_oikk, (2, 3, 1, 0)).reshape(kk, C, C)
    w_big = jnp.einsum("qhjHJt,tio->qhjiHJo", jnp.asarray(route), w_taps)
    w_big = w_big.reshape(n_q * G * W * C, G * W * C).astype(mxu_dtype)

    b_row = jnp.tile(b.astype(jnp.float32), G * W).reshape(1, G * W * C)
    return w_big, b_row


# ----------------------------------------------------------------------------
# Pallas kernel
# ----------------------------------------------------------------------------
def _make_kernel(Hg, L, q_list, neg_slope, mxu_dtype):
    """Fused per-image kernel: x -> x + conv2(lrelu(conv1(x)))."""

    def row_shift(v, q):
        # result[r, :] = v[r + q, :], zero-filled outside [0, Hg).
        # The image boundary IS the array boundary (one image per program),
        # so this realizes the H-direction zero padding with no padded scratch.
        if q == 0:
            return v
        z = jnp.zeros((abs(q), L), v.dtype)
        if q > 0:
            return jnp.concatenate([v[q:, :], z], axis=0)
        return jnp.concatenate([z, v[:q, :]], axis=0)

    def kernel(x_ref, w1_ref, b1_ref, w2_ref, b2_ref, out_ref):
        x = x_ref[...].astype(jnp.float32)                 # (Hg, L), lane-dense

        def conv(v, w_ref, b_ref):
            # Single MXU contraction per conv: (Hg, n_q*L) @ (n_q*L, L).
            parts = [row_shift(v, q) for q in q_list]
            lhs = parts[0] if len(parts) == 1 else jnp.concatenate(parts, axis=1)
            acc = jnp.dot(lhs.astype(mxu_dtype), w_ref[...],
                          preferred_element_type=jnp.float32)
            return acc + b_ref[...].astype(jnp.float32)    # f32 bias add (VPU)

        h = conv(x, w1_ref, b1_ref)
        h = jnp.where(h >= 0.0, h, neg_slope * h)          # LeakyReLU, f32 VPU
        y = conv(h, w2_ref, b2_ref)
        out_ref[...] = (x + y).astype(out_ref.dtype)       # residual, lane-dense store

    return kernel


# ----------------------------------------------------------------------------
# Wrapper
# ----------------------------------------------------------------------------
def dilate_res_block(x_nchw, w1_oikk, b1, w2_oikk, b2, *, kernel_size, dilation,
                     neg_slope=LRELU_NEG_SLOPE, mxu_dtype=jnp.float32):
    """Fused DilateResBlock forward (stride=1).

    x: (N, C, H, W); conv weights in PyTorch (Cout, Cin, k, k) layout (already
    spectrally normalized); biases (C,).  Returns (N, C, H, W).
    """
    N, C, H, W = x_nchw.shape
    k = kernel_size
    pad = (k - 1) // 2 * dilation
    WC = W * C

    G = _choose_row_packing(H, WC)          # image rows packed per compute row
    L = G * WC                              # lane width (multiple of 128 if possible)
    Hg = H // G                             # compute rows per image
    assert Hg % 8 == 0 or N == 1, "unsupported (H, W, C) tiling for batched input"

    # Vertical tap offsets, expressed as packed-row shifts.
    q_list = tuple(sorted({(h + ky * dilation - pad) // G
                           for ky in range(k) for h in range(G)}))
    n_q = len(q_list)
    assert max(abs(q) for q in q_list) < Hg, "dilation too large for this spatial size"

    # Layout glue (outside the kernel): NCHW -> NHWC -> packed (N*Hg, L).
    x_packed = jnp.transpose(x_nchw, (0, 2, 3, 1)).reshape(N * Hg, L)

    # Parameter glue: fold taps/padding/row-packing into block weights.
    w1p, b1p = _pack_params(w1_oikk, b1, W, C, k, dilation, pad, G, q_list, mxu_dtype)
    w2p, b2p = _pack_params(w2_oikk, b2, W, C, k, dilation, pad, G, q_list, mxu_dtype)

    kern = _make_kernel(Hg, L, q_list, neg_slope, mxu_dtype)

    itemsize = jnp.dtype(mxu_dtype).itemsize
    cost = pl.CostEstimate(
        flops=int(N * 2 * 2 * Hg * (n_q * L) * L),          # two packed matmuls / image
        transcendentals=0,
        bytes_accessed=int(2 * N * H * WC * 4               # x in + out
                           + 2 * n_q * L * L * itemsize     # packed weights
                           + 2 * L * 4),                    # packed biases
    )

    out_packed = pl.pallas_call(
        kern,
        out_shape=jax.ShapeDtypeStruct((N * Hg, L), x_nchw.dtype),
        grid=(N,),                                           # one image per program
        in_specs=[
            pl.BlockSpec((Hg, L), lambda n: (n, 0)),         # per-image activations
            pl.BlockSpec((n_q * L, L), lambda n: (0, 0)),    # packed conv1 weight
            pl.BlockSpec((1, L), lambda n: (0, 0)),          # conv1 bias (tiled)
            pl.BlockSpec((n_q * L, L), lambda n: (0, 0)),    # packed conv2 weight
            pl.BlockSpec((1, L), lambda n: (0, 0)),          # conv2 bias (tiled)
        ],
        out_specs=pl.BlockSpec((Hg, L), lambda n: (n, 0)),
        compiler_params=pltpu.CompilerParams(
            dimension_semantics=("parallel",),               # megacore over batch (v7x)
            vmem_limit_bytes=32 * 1024 * 1024),              # explicit, safe on v5e/v6e/v7x
        cost_estimate=cost,
    )(x_packed, w1p, b1p, w2p, b2p)

    # Back to NCHW (layout glue).
    return jnp.transpose(out_packed.reshape(N, H, W, C), (0, 3, 1, 2))


# ----------------------------------------------------------------------------
# Parameter preprocessing glue + plain-JAX reference
# ----------------------------------------------------------------------------
def spectral_normalize(w_oikk, key, n_iter=1, eps=1e-12):
    """PyTorch-style spectral norm (power iteration) on (Cout, Cin, k, k)."""
    # TODO(synk): PyTorch's utils.spectral_norm keeps a persistent power-iteration
    # vector `u` across forward calls; here `u` is re-sampled deterministically.
    cout = w_oikk.shape[0]
    w_mat = w_oikk.reshape(cout, -1)
    u = jax.random.normal(key, (cout,), dtype=w_mat.dtype)
    u = u / (jnp.linalg.norm(u) + eps)
    v = None
    for _ in range(n_iter):
        v = w_mat.T @ u
        v = v / (jnp.linalg.norm(v) + eps)
        u = w_mat @ v
        u = u / (jnp.linalg.norm(u) + eps)
    sigma = u @ (w_mat @ v)
    return w_oikk / sigma


def reference_forward(x_nchw, w1_sn, b1, w2_sn, b2, *, dilation, pad,
                      neg_slope=LRELU_NEG_SLOPE):
    """Plain-JAX reference (lax.conv), NCHW in / NCHW out."""
    def conv(inp, w_oikk, b):
        y = jax.lax.conv_general_dilated(
            inp, w_oikk, window_strides=(1, 1),
            padding=[(pad, pad), (pad, pad)],
            rhs_dilation=(dilation, dilation),
            dimension_numbers=("NCHW", "OIHW", "NCHW"))
        return y + b.reshape(1, -1, 1, 1)

    h = conv(x_nchw, w1_sn, b1)
    h = jnp.where(h >= 0.0, h, neg_slope * h)
    return x_nchw + conv(h, w2_sn, b2)


# ----------------------------------------------------------------------------
# Self-test
# ----------------------------------------------------------------------------
if __name__ == "__main__":
    # DilateResBlock(input_ch=4, kernel=3, stride=1, dilation=2) on a
    # (2, 4, 16, 16) NCHW input.  Stride must be 1 for the residual add.
    N, C, H, W = 2, 4, 16, 16
    K, DIL = 3, 2
    PAD = (K - 1) // 2 * DIL

    key = jax.random.PRNGKey(0)
    kx, kw1, kb1, kw2, kb2, ku1, ku2 = jax.random.split(key, 7)

    x_nchw = jax.random.normal(kx, (N, C, H, W), dtype=jnp.float32)

    # Deterministic parameter init (PyTorch conv weight layout: Cout,Cin,k,k).
    fan_in = C * K * K
    w1_raw = jax.random.normal(kw1, (C, C, K, K), jnp.float32) / jnp.sqrt(fan_in)
    w2_raw = jax.random.normal(kw2, (C, C, K, K), jnp.float32) / jnp.sqrt(fan_in)
    b1 = 0.01 * jax.random.normal(kb1, (C,), jnp.float32)
    b2 = 0.01 * jax.random.normal(kb2, (C,), jnp.float32)

    # Spectral normalization (weight setup glue, done once in plain JAX).
    w1_sn = spectral_normalize(w1_raw, ku1)
    w2_sn = spectral_normalize(w2_raw, ku2)

    ref = jax.block_until_ready(
        reference_forward(x_nchw, w1_sn, b1, w2_sn, b2, dilation=DIL, pad=PAD))

    # f32 MXU operands (safe on all TPU generations) -- strict accuracy check.
    out = jax.block_until_ready(
        dilate_res_block(x_nchw, w1_sn, b1, w2_sn, b2,
                         kernel_size=K, dilation=DIL, mxu_dtype=jnp.float32))
    assert out.shape == (N, C, H, W)
    err = jnp.max(jnp.abs(out - ref))
    assert jnp.allclose(out, ref, atol=5e-4, rtol=5e-4), f"f32 max abs err {err}"

    # bf16 MXU operands (recommended on v6e/v7x), f32 accumulate + f32 VPU math.
    out_bf16 = jax.block_until_ready(
        dilate_res_block(x_nchw, w1_sn, b1, w2_sn, b2,
                         kernel_size=K, dilation=DIL, mxu_dtype=jnp.bfloat16))
    err_bf16 = jnp.max(jnp.abs(out_bf16 - ref))
    assert jnp.allclose(out_bf16, ref, atol=5e-2, rtol=5e-2), (
        f"bf16 max abs err {err_bf16}")

    print("KERNEL_OK")
</pallas_src>

<mosaic_0001>
module attributes {stable_mosaic.version = 11 : i64} {
  func.func @kernel(%arg0: i32, %arg1: memref<8x128xf32, #tpu.memory_space<vmem>>, %arg2: memref<384x128xf32, #tpu.memory_space<vmem>>, %arg3: memref<1x128xf32, #tpu.memory_space<vmem>>, %arg4: memref<384x128xf32, #tpu.memory_space<vmem>>, %arg5: memref<1x128xf32, #tpu.memory_space<vmem>>, %arg6: memref<8x128xf32, #tpu.memory_space<vmem>>) attributes {dimension_semantics = [#tpu.dimension_semantics<parallel>], iteration_bounds = array<i64: 2>, scalar_prefetch = 0 : i64, scratch_operands = 0 : i64, tpu.core_type = #tpu.core_type<tc>, window_params = [{transform_indices = @transform_0, window_bounds = array<i64: 8, 128>}, {pipeline_mode = #tpu.pipeline_mode<synchronous>, transform_indices = @transform_1, window_bounds = array<i64: 384, 128>}, {pipeline_mode = #tpu.pipeline_mode<synchronous>, transform_indices = @transform_2, window_bounds = array<i64: 1, 128>}, {pipeline_mode = #tpu.pipeline_mode<synchronous>, transform_indices = @transform_3, window_bounds = array<i64: 384, 128>}, {pipeline_mode = #tpu.pipeline_mode<synchronous>, transform_indices = @transform_4, window_bounds = array<i64: 1, 128>}, {transform_indices = @transform_5, window_bounds = array<i64: 8, 128>}]} {
    %c0 = arith.constant 0 : index
    %c0_0 = arith.constant 0 : index
    %0 = vector.load %arg1[%c0, %c0_0] : memref<8x128xf32, #tpu.memory_space<vmem>>, vector<8x128xf32>
    %cst = arith.constant 0.000000e+00 : f32
    %1 = vector.broadcast %cst : f32 to vector<1x128xf32>
    %2 = vector.extract_strided_slice %0 {offsets = [0, 0], sizes = [7, 128], strides = [1, 1]} : vector<8x128xf32> to vector<7x128xf32>
    %3 = tpu.concatenate %1, %2 in 0 : vector<1x128xf32>, vector<7x128xf32> -> vector<8x128xf32>
    %cst_1 = arith.constant 0.000000e+00 : f32
    %4 = vector.broadcast %cst_1 : f32 to vector<1x128xf32>
    %5 = vector.extract_strided_slice %0 {offsets = [1, 0], sizes = [7, 128], strides = [1, 1]} : vector<8x128xf32> to vector<7x128xf32>
    %6 = tpu.concatenate %5, %4 in 0 : vector<7x128xf32>, vector<1x128xf32> -> vector<8x128xf32>
    %7 = tpu.concatenate %3, %0, %6 in 1 : vector<8x128xf32>, vector<8x128xf32>, vector<8x128xf32> -> vector<8x384xf32>
    %c0_2 = arith.constant 0 : index
    %c0_3 = arith.constant 0 : index
    %8 = vector.load %arg2[%c0_2, %c0_3] : memref<384x128xf32, #tpu.memory_space<vmem>>, vector<384x128xf32>
    %cst_4 = arith.constant dense<0.000000e+00> : vector<8x128xf32>
    %9 = tpu.matmul %7, %8, %cst_4 {dimension_numbers = #tpu.dot_dimension_numbers<[1], [0], [0], [1], [0, 0, 1, 1], [], []>} : vector<8x384xf32>, vector<384x128xf32>, vector<8x128xf32> -> vector<8x128xf32>
    %c0_5 = arith.constant 0 : index
    %c0_6 = arith.constant 0 : index
    %10 = vector.load %arg3[%c0_5, %c0_6] : memref<1x128xf32, #tpu.memory_space<vmem>>, vector<1x128xf32>
    %11 = vector.broadcast %10 : vector<1x128xf32> to vector<8x128xf32>
    %12 = arith.addf %9, %11 : vector<8x128xf32>
    %cst_7 = arith.constant 0.000000e+00 : f32
    %13 = vector.broadcast %cst_7 : f32 to vector<8x128xf32>
    %14 = arith.cmpf oge, %12, %13 : vector<8x128xf32>
    %cst_8 = arith.constant 2.000000e-01 : f32
    %15 = vector.broadcast %cst_8 : f32 to vector<8x128xf32>
    %16 = arith.mulf %15, %12 : vector<8x128xf32>
    %17 = arith.select %14, %12, %16 : vector<8x128xi1>, vector<8x128xf32>
    %cst_9 = arith.constant 0.000000e+00 : f32
    %18 = vector.broadcast %cst_9 : f32 to vector<1x128xf32>
    %19 = vector.extract_strided_slice %17 {offsets = [0, 0], sizes = [7, 128], strides = [1, 1]} : vector<8x128xf32> to vector<7x128xf32>
    %20 = tpu.concatenate %18, %19 in 0 : vector<1x128xf32>, vector<7x128xf32> -> vector<8x128xf32>
    %cst_10 = arith.constant 0.000000e+00 : f32
    %21 = vector.broadcast %cst_10 : f32 to vector<1x128xf32>
    %22 = vector.extract_strided_slice %17 {offsets = [1, 0], sizes = [7, 128], strides = [1, 1]} : vector<8x128xf32> to vector<7x128xf32>
    %23 = tpu.concatenate %22, %21 in 0 : vector<7x128xf32>, vector<1x128xf32> -> vector<8x128xf32>
    %24 = tpu.concatenate %20, %17, %23 in 1 : vector<8x128xf32>, vector<8x128xf32>, vector<8x128xf32> -> vector<8x384xf32>
    %c0_11 = arith.constant 0 : index
    %c0_12 = arith.constant 0 : index
    %25 = vector.load %arg4[%c0_11, %c0_12] : memref<384x128xf32, #tpu.memory_space<vmem>>, vector<384x128xf32>
    %cst_13 = arith.constant dense<0.000000e+00> : vector<8x128xf32>
    %26 = tpu.matmul %24, %25, %cst_13 {dimension_numbers = #tpu.dot_dimension_numbers<[1], [0], [0], [1], [0, 0, 1, 1], [], []>} : vector<8x384xf32>, vector<384x128xf32>, vector<8x128xf32> -> vector<8x128xf32>
    %c0_14 = arith.constant 0 : index
    %c0_15 = arith.constant 0 : index
    %27 = vector.load %arg5[%c0_14, %c0_15] : memref<1x128xf32, #tpu.memory_space<vmem>>, vector<1x128xf32>
    %28 = vector.broadcast %27 : vector<1x128xf32> to vector<8x128xf32>
    %29 = arith.addf %26, %28 : vector<8x128xf32>
    %30 = arith.addf %0, %29 : vector<8x128xf32>
    %c0_16 = arith.constant 0 : index
    %c0_17 = arith.constant 0 : index
    %31 = vector.load %arg6[%c0_16, %c0_17] : memref<8x128xf32, #tpu.memory_space<vmem>>, vector<8x128xf32>
    tpu.vector_store %arg6[%c0_16, %c0_17], %30 {strides = array<i32>} : memref<8x128xf32, #tpu.memory_space<vmem>>, vector<8x128xf32>,
    return
  }
  func.func @transform_0(%arg0: i32) -> (i32, i32) {
    %c0_i32 = arith.constant 0 : i32
    %c0_i32_0 = arith.constant 0 : i32
    return %arg0, %c0_i32 : i32, i32
  }
  func.func @transform_1(%arg0: i32) -> (i32, i32) {
    %c0_i32 = arith.constant 0 : i32
    %c0_i32_0 = arith.constant 0 : i32
    %c0_i32_1 = arith.constant 0 : i32
    return %c0_i32, %c0_i32_0 : i32, i32
  }
  func.func @transform_2(%arg0: i32) -> (i32, i32) {
    %c0_i32 = arith.constant 0 : i32
    %c0_i32_0 = arith.constant 0 : i32
    %c0_i32_1 = arith.constant 0 : i32
    return %c0_i32, %c0_i32_0 : i32, i32
  }
  func.func @transform_3(%arg0: i32) -> (i32, i32) {
    %c0_i32 = arith.constant 0 : i32
    %c0_i32_0 = arith.constant 0 : i32
    %c0_i32_1 = arith.constant 0 : i32
    return %c0_i32, %c0_i32_0 : i32, i32
  }
  func.func @transform_4(%arg0: i32) -> (i32, i32) {
    %c0_i32 = arith.constant 0 : i32
    %c0_i32_0 = arith.constant 0 : i32
    %c0_i32_1 = arith.constant 0 : i32
    return %c0_i32, %c0_i32_0 : i32, i32
  }
  func.func @transform_5(%arg0: i32) -> (i32, i32) {
    %c0_i32 = arith.constant 0 : i32
    %c0_i32_0 = arith.constant 0 : i32
    return %arg0, %c0_i32 : i32, i32
  }
}

</mosaic_0001>

<bundles_post_ra>
// kernel: tpu_custom_call.1
= control target key start
LH: loop header
LB: loop body
LE: loop exit
PB: predicated region body
PF: predicated region fallthrough
CT: control target
= control target key end

     0   :  { %10 = vsyncpa [#allocation3], 0  ;;  %s1089_s0 = inlined_call_operand.hbm [shape: f32[16,128], index: 0, kind: input, shape index: {}]   ;;  %s1090_s1 = inlined_call_operand.hbm [shape: f32[384,128], index: 1, kind: input, shape index: {}]   ;;  %s1091_s2 = inlined_call_operand.vmem [shape: f32[1,128], index: 2, kind: input, shape index: {}]   ;;  %s1092_s3 = inlined_call_operand.hbm [shape: f32[384,128], index: 3, kind: input, shape index: {}]   ;;  %s1093_s4 = inlined_call_operand.vmem [shape: f32[1,128], index: 4, kind: input, shape index: {}]   ;;  %s1094_s5 = inlined_call_operand.hbm [shape: f32[16,128], index: 5, kind: output, shape index: {}]  }
   0x1   :  { %12 = vsyncpa [#allocation3 + $0x1], 0 }
   0x2   :  { %13 = vsyncpa [#allocation6], 0 }
   0x3   :  { %14 = vsyncpa [#allocation4], 0 }
   0x4   :  { %16 = vsyncpa [#allocation4 + $0x1], 0  ;;  %s915_s18 = smov 0   ;;  %s917_s19 = smov 0  }
   0x5   :  { %s919_s20 = smov 0   ;;  %s921_s21 = smov 0  }
   0x6 LB: > { %s174_s24 = sshll.u32 %s1090_s1, 4  ;;  %s939_s25 = sadd.s32 4294967295, %s879_s21   ;;  %s879_s21 = sphi %s921_s21, %s1107_s21   ;;  %s875_s20 = sphi %s919_s20, %s1106_s20   ;;  %s871_s19 = sphi %s917_s19, %s1105_s19   ;;  %s867_s18 = sphi %s915_s18, %s1104_s18   ;;  %s175_s24 = int_to_ptr.hbm [resolvable:$true] %s174_s24 }
   0x7   : > { %p627_p0 = scmp.ge.s32.totalorder %s879_s21, 1  ;;  %p43_p1 = scmp.eq.s32.totalorder %s939_s25, 0 }
   0x8   : > { %p163_p2 = scmp.lt.s32.totalorder %s879_s21, 3  ;;  %s881_s27 = smov [#allocation5]  }
   0x9   : > { %s176_s28 = sshll.u32 %s881_s27, 4  ;;  %s191_s6 = sshll.u32 %s1092_s3, 4  ;;  %s177_s28 = int_to_ptr.vmem [resolvable:$true] %s176_s28  ;;  %s192_s6 = int_to_ptr.hbm [resolvable:$true] %s191_s6 }
   0xa   : > { %p944_p3 = pnand %p627_p0, %p163_p2  ;;  %s882_s7 = smov [#allocation7]  }
   0xb   : > { %s193_s8 = sshll.u32 %s882_s7, 4  ;;  %s883_s9 = smov 128   ;;  %s194_s8 = int_to_ptr.vmem [resolvable:$true] %s193_s8 }
   0xc   : > { %p660_p4 = pneg %p944_p3  ;;  %s884_s10 = smov 8  }
   0xd   : > { %s626_s11 = sadd.s32 4294967294, %s879_s21   ;;  %s958_s12 = sadd.s32 1, %s879_s21  }
   0xe   : > { %p661_p6 = pnand %p660_p4, %p43_p1  ;;  %s26_s13 = ssub.s32 %s879_s21, %s958_s12 }
   0xf   : > { %s29_s14 = sadd.s32 1, %s875_s20  ;;  %p27_p7 = scmp.eq.s32.totalorder %s26_s13, 0 }
  0x10   : > { %663 = dma.hbm_to_vmem [thread:$0]  (!%p661_p6), %s175_s24, 6144, %s177_s28, [#allocation6], %s883_s9, %s883_s9, %s884_s10  }
  0x11   : > { %666 = dma.hbm_to_vmem [thread:$0]  (!%p661_p6), %s192_s6, 6144, %s194_s8, [#allocation6], %s883_s9, %s883_s9, %s884_s10  }
  0x12   : > { %p36_p8 = scmp.ne.s32.totalorder %s875_s20, %s871_s19  ;;  %p37_p9 = scmp.eq.s32.totalorder %s879_s21, 0 }
  0x13   : > { %p42_p10 = scmp.ne.s32.totalorder %s871_s19, %s867_s18  ;;  %p150_p13 = scmp.eq.s32.totalorder %s939_s25, 1 }
  0x14   : > { %s969_s15 = scalar_select %p27_p7, %s875_s20, %s29_s14  }
  0x15   : > { %p971_p11 = por %p37_p9, %p36_p8  ;;  %p977_p12 = por %p43_p1, %p42_p10 }
  0x16   : > { %p156_p0 = scmp.eq.s32.totalorder %s626_s11, 1  ;;  %p677_p2 = scmp.lt.s32.totalorder %s879_s21, 2 }
  0x17   : > { %s210_s22 = sand.u32 1, %s875_s20   ;;  %p984_p4 = por %p150_p13, %p36_p8 }
  0x18   : > { %p988_p6 = por %p156_p0, %p42_p10  ;;  %s631_s27 = sshll.u32 %s210_s22, 3 }
  0x19   : > { %s632_s28 = sshll.u32 %s879_s21, 3  ;;  %s214_s7 = scalar_lea.vmem [#allocation2], %s631_s27 }
  0x1a   : > { %s218_s6 = scalar_lea.hbm %s1089_s0, %s632_s28  ;;  %s222_s8 = sshll.u32 %s214_s7, 4  ;;  %s223_s8 = int_to_ptr.vmem [resolvable:$true] %s222_s8 }
  0x1b   : > { %s220_s9 = sshll.u32 %s218_s6, 4  ;;  %p998_p7 = pnand %p677_p2, %p971_p11  ;;  %s221_s9 = int_to_ptr.hbm [resolvable:$true] %s220_s9 }
  0x1c   : > { %s211_s11 = scalar_lea.sflag [#allocation3], %s210_s22  ;;  %s779_s13 = sshra.s32 %s221_s9, 4  ;;  %s780_s13 = int_to_ptr.hbm [resolvable:$true] %s779_s13 }
  0x1d   : > { %s781_s14 = scalar_lea.hbm %s780_s13, 8  ;;  %p783_p9 = pneg %p998_p7 }
  0x1e   : > { %p782_p8 = scmp.ne.s32.totalorder %s780_s13, %s781_s14  ;;  %s786_s29 = scalar_lea.hbm %s1089_s0, 16 }
  0x1f   : > { %p787_p11 = scmp.lt.s32.totalorder %s780_s13, %s1089_s0  ;;  %p788_p0 = scmp.lt.s32.totalorder %s786_s29, %s781_s14 }
  0x20   : > { %p784_p10 = pnand %p783_p9, %p782_p8 }
  0x21   : > { %p789_p2 = por %p788_p0, %p787_p11 }
  0x22   : > { %p785_p13 = pneg %p784_p10 }
  0x24   : > { %p790_p5 = pnand %p789_p2, %p785_p13 }
  0x26   : > { %793 = shalt.err (!%p790_p5)
}
  0x27   : > { %670 = dma.hbm_to_vmem [thread:$0]  (!%p998_p7), %s221_s9, 128, %s223_s8, %s211_s11  }
  0x28   : > { %231 = sbr.rel (%p944_p3) target bundleno = 362 (0x16a), region = 40  ;;  %s1015_s22 = sand.u32 (!%p944_p3), 1, %s871_s19  }
  0x29   : > { %s634_s6 = sshll.u32 (!%p944_p3), %s1015_s22, 3  ;;  %s234_s7 = scalar_lea.sflag (!%p944_p3), [#allocation3], %s1015_s22 }
  0x2a   : > { %s1021_s13 = scalar_lea.vmem (!%p944_p3), [#allocation2], %s634_s6 }
  0x2d   : > { %854 = dma.done.wait (%p977_p12), %s234_s7, 128  }
  0x2e   : > { %856 = vsyncadd (%p977_p12), %s234_s7, 4294967168 }
  0x2f   : > { %858 = dma.done.wait (%p43_p1), [#allocation6], 12288  }
  0x30   : > { %860 = vsyncadd (%p43_p1), [#allocation6], 4294955008  ;;  %v332_v0 = vld [vmem:[#allocation5 + $0x178] sm:$0xff]  ;;  %v331_v2 = vld [vmem:[#allocation5 + $0x170] sm:$0xff]  ;;  %vm279_vm0 = vcmask 1040384   ;;  %vm283_vm1 = vcmask 1046528  }
  0x31   : > { %v300_v1 = vld [vmem:[#allocation5 + $0x78] sm:$0xff]  ;;  %377 = vmatpush.msra.mxu2 %v332_v0  ;;  %v299_v3 = vld [vmem:[#allocation5 + $0x70] sm:$0xff]  ;;  %v330_v5 = vld [vmem:[#allocation5 + $0x168] sm:$0xff]  ;;  %s645_s10 = sshll.u32 %s939_s25, 3  ;;  %s274_s28 = scalar_lea.vmem [#allocation8], %s634_s6 }
  0x32   : > { %337 = vmatpush.msra.mxu0 %v300_v1  ;;  %v316_v4 = vld [vmem:[#allocation5 + $0xf8] sm:$0xff]  ;;  %v298_v6 = vld [vmem:[#allocation5 + $0x68] sm:$0xff]  ;;  %v315_v7 = vld [vmem:[#allocation5 + $0xf0] sm:$0xff]  ;;  %s532_s27 = scalar_lea.hbm %s1094_s5, %s645_s10  ;;  %s534_s29 = sshll.u32 %s274_s28, 4  ;;  %s535_s29 = int_to_ptr.vmem [resolvable:$true] %s534_s29 }
  0x33   : > { %357 = vmatpush.msra.mxu1 %v316_v4  ;;  %378 = vmatpush.msra.mxu2 %v331_v2  ;;  %v314_v8 = vld [vmem:[#allocation5 + $0xe8] sm:$0xff]  ;;  %v329_v9 = vld [vmem:[#allocation5 + $0x160] sm:$0xff]  ;;  %v328_v12 = vld [vmem:[#allocation5 + $0x158] sm:$0xff]  ;;  %s536_s30 = sshll.u32 %s532_s27, 4  ;;  %s522_s25 = scalar_lea.sflag [#allocation4], %s1015_s22  ;;  %s537_s30 = int_to_ptr.hbm [resolvable:$true] %s536_s30 }
  0x34   : > { %338 = vmatpush.msra.mxu0 %v299_v3  ;;  %v297_v10 = vld [vmem:[#allocation5 + $0x60] sm:$0xff]  ;;  %v296_v13 = vld [vmem:[#allocation5 + $0x58] sm:$0xff]  ;;  %v327_v15 = vld [vmem:[#allocation5 + $0x150] sm:$0xff]  ;;  %s823_s16 = sshra.s32 %s537_s30, 4  ;;  %s829_s6 = scalar_lea.hbm %s1094_s5, 16  ;;  %s824_s16 = int_to_ptr.hbm [resolvable:$true] %s823_s16 }
  0x35   : > { %358 = vmatpush.msra.mxu1 %v315_v7  ;;  %379 = vmatpush.msra.mxu2 %v330_v5  ;;  %v313_v11 = vld [vmem:[#allocation5 + $0xe0] sm:$0xff]  ;;  %v312_v14 = vld [vmem:[#allocation5 + $0xd8] sm:$0xff]  ;;  %v295_v16 = vld [vmem:[#allocation5 + $0x50] sm:$0xff]  ;;  %s825_s7 = scalar_lea.hbm %s824_s16, 8  ;;  %p830_p12 = scmp.lt.s32.totalorder %s824_s16, %s1094_s5 }
  0x36   : > { %339 = vmatpush.msra.mxu0 %v298_v6  ;;  %v311_v17 = vld [vmem:[#allocation5 + $0xd0] sm:$0xff]  ;;  %v326_v18 = vld [vmem:[#allocation5 + $0x148] sm:$0xff]  ;;  %v325_v21 = vld [vmem:[#allocation5 + $0x140] sm:$0xff]  ;;  %p826_p1 = scmp.ne.s32.totalorder %s824_s16, %s825_s7  ;;  %p831_p7 = scmp.lt.s32.totalorder %s829_s6, %s825_s7 }
  0x37   : > { %359 = vmatpush.msra.mxu1 %v314_v8  ;;  %380 = vmatpush.msra.mxu2 %v329_v9  ;;  %v294_v19 = vld [vmem:[#allocation5 + $0x48] sm:$0xff]  ;;  %v293_v22 = vld [vmem:[#allocation5 + $0x40] sm:$0xff]  ;;  %v324_v24 = vld [vmem:[#allocation5 + $0x138] sm:$0xff] }
  0x38   : > { %340 = vmatpush.msra.mxu0 %v297_v10  ;;  %v310_v20 = vld [vmem:[#allocation5 + $0xc8] sm:$0xff]  ;;  %v309_v23 = vld [vmem:[#allocation5 + $0xc0] sm:$0xff]  ;;  %v292_v25 = vld [vmem:[#allocation5 + $0x38] sm:$0xff]  ;;  %p827_p3 = pnand %p826_p1, %p984_p4  ;;  %p832_p8 = por %p831_p7, %p830_p12 }
  0x39   : > { %360 = vmatpush.msra.mxu1 %v313_v11  ;;  %381 = vmatpush.msra.mxu2 %v328_v12  ;;  %v308_v26 = vld [vmem:[#allocation5 + $0xb8] sm:$0xff]  ;;  %v323_v27 = vld [vmem:[#allocation5 + $0x130] sm:$0xff]  ;;  %v322_v31 = vld [vmem:[#allocation5 + $0x128] sm:$0xff] }
  0x3a   : > { %341 = vmatpush.msra.mxu0 %v296_v13  ;;  %v291_v28 = vld [vmem:[#allocation5 + $0x30] sm:$0xff]  ;;  %v422_v30 = vld [vmem:[#allocation7 + $0x78] sm:$0xff]  ;;  %v290_v32 = vld [vmem:[#allocation5 + $0x28] sm:$0xff]  ;;  %p828_p5 = pneg %p827_p3 }
  0x3b   : > { %361 = vmatpush.msra.mxu1 %v312_v14  ;;  %382 = vmatpush.msra.mxu2 %v327_v15  ;;  %v307_v29 = vld [vmem:[#allocation5 + $0xb0] sm:$0xff]  ;;  %v306_v34 = vld [vmem:[#allocation5 + $0xa8] sm:$0xff]  ;;  %v321_v36 = vld [vmem:[#allocation5 + $0x120] sm:$0xff] }
  0x3c   : > { %342 = vmatpush.msra.mxu0 %v295_v16  ;;  %459 = vmatpush.msra.mxu3 %v422_v30  ;;  %v421_v33 = vld [vmem:[#allocation7 + $0x70] sm:$0xff]  ;;  %v420_v35 = vld [vmem:[#allocation7 + $0x68] sm:$0xff]  ;;  %v289_v37 = vld [vmem:[#allocation5 + $0x20] sm:$0xff]  ;;  %p833_p9 = pnand %p832_p8, %p828_p5 }
  0x3d   : > { %362 = vmatpush.msra.mxu1 %v311_v17  ;;  %383 = vmatpush.msra.mxu2 %v326_v18  ;;  %v305_v38 = vld [vmem:[#allocation5 + $0xa0] sm:$0xff]  ;;  %v320_v40 = vld [vmem:[#allocation5 + $0x118] sm:$0xff]  ;;  %v319_v44 = vld [vmem:[#allocation5 + $0x110] sm:$0xff] }
  0x3e   : > { %343 = vmatpush.msra.mxu0 %v294_v19  ;;  %460 = vmatpush.msra.mxu3 %v421_v33  ;;  %v419_v39 = vld [vmem:[#allocation7 + $0x60] sm:$0xff]  ;;  %v288_v41 = vld [vmem:[#allocation5 + $0x18] sm:$0xff]  ;;  %v287_v45 = vld [vmem:[#allocation5 + $0x10] sm:$0xff] }
  0x3f   : > { %363 = vmatpush.msra.mxu1 %v310_v20  ;;  %384 = vmatpush.msra.mxu2 %v325_v21  ;;  %v304_v42 = vld [vmem:[#allocation5 + $0x98] sm:$0xff]  ;;  %v303_v46 = vld [vmem:[#allocation5 + $0x90] sm:$0xff]  ;;  %v318_v49 = vld [vmem:[#allocation5 + $0x108] sm:$0xff] }
  0x40   : > { %344 = vmatpush.msra.mxu0 %v293_v22  ;;  %461 = vmatpush.msra.mxu3 %v420_v35  ;;  %v418_v43 = vld [vmem:[#allocation7 + $0x58] sm:$0xff]  ;;  %v417_v48 = vld [vmem:[#allocation7 + $0x50] sm:$0xff]  ;;  %v286_v50 = vld [vmem:[#allocation5 + $0x8] sm:$0xff] }
  0x41   : > { %364 = vmatpush.msra.mxu1 %v309_v23  ;;  %385 = vmatpush.msra.mxu2 %v324_v24  ;;  %v1032_v47 = vld [vmem:[%s1021_s13] sm:$0xff]  ;;  %v302_v51 = vld [vmem:[#allocation5 + $0x88] sm:$0xff]  ;;  %v317_v53 = vld [vmem:[#allocation5 + $0x100] sm:$0xff] }
  0x42   : > { %345 = vmatpush.msra.mxu0 %v292_v25  ;;  %462 = vmatpush.msra.mxu3 %v419_v39  ;;  %v416_v52 = vld [vmem:[#allocation7 + $0x48] sm:$0xff]  ;;  %v281_v54 = vrot.slane %v1032_v47, 1  ;;  %v285_v55 = vld [vmem:[#allocation5] sm:$0xff]  ;;  %v277_v56 = vrot.slane %v1032_v47, 7  ;;  %vm1036_vm2 = vmneg %vm279_vm0 }
  0x43   : > { %365 = vmatpush.msra.mxu1 %v308_v26  ;;  %386 = vmatpush.msra.mxu2 %v323_v27  ;;  %v301_v58 = vld [vmem:[#allocation5 + $0x80] sm:$0xff]  ;;  %v438_v59 = vld [vmem:[#allocation7 + $0xf8] sm:$0xff]  ;;  %v437_v61 = vld [vmem:[#allocation7 + $0xf0] sm:$0xff] }
  0x44   : > { %346 = vmatpush.msra.mxu0 %v291_v28  ;;  %463 = vmatpush.msra.mxu3 %v418_v43  ;;  %v415_v60 = vld [vmem:[#allocation7 + $0x40] sm:$0xff]  ;;  %v454_v62 = vld [vmem:[#allocation7 + $0x178] sm:$0xff]  ;;  %v436_v0 = vld [vmem:[#allocation7 + $0xe8] sm:$0xff] }
  0x45   : > { %366 = vmatpush.msra.mxu1 %v307_v29  ;;  %387 = vmatpush.msra.mxu2 %v322_v31  ;;  %v414_v63 = vld [vmem:[#allocation7 + $0x38] sm:$0xff]  ;;  %v453_v1 = vld [vmem:[#allocation7 + $0x170] sm:$0xff]  ;;  %v435_v3 = vld [vmem:[#allocation7 + $0xe0] sm:$0xff] }
  0x46   : > { %347 = vmatpush.msra.mxu0 %v290_v32  ;;  %464 = vmatpush.msra.mxu3 %v417_v48  ;;  %v413_v2 = vld [vmem:[#allocation7 + $0x30] sm:$0xff]  ;;  %v452_v4 = vld [vmem:[#allocation7 + $0x168] sm:$0xff]  ;;  %v434_v5 = vld [vmem:[#allocation7 + $0xd8] sm:$0xff] }
  0x47   : > { %367 = vmatpush.msra.mxu1 %v306_v34  ;;  %388 = vmatpush.msra.mxu2 %v321_v36  ;;  %v451_v6 = vld [vmem:[#allocation7 + $0x160] sm:$0xff]  ;;  %v433_v7 = vld [vmem:[#allocation7 + $0xd0] sm:$0xff]  ;;  %v450_v8 = vld [vmem:[#allocation7 + $0x158] sm:$0xff] }
  0x48   : > { %348 = vmatpush.msra.mxu0 %v289_v37  ;;  %465 = vmatpush.msra.mxu3 %v416_v52  ;;  %v432_v9 = vld [vmem:[#allocation7 + $0xc8] sm:$0xff]  ;;  %v449_v10 = vld [vmem:[#allocation7 + $0x150] sm:$0xff]  ;;  %v431_v11 = vld [vmem:[#allocation7 + $0xc0] sm:$0xff] }
  0x49   : > { %368 = vmatpush.msra.mxu1 %v305_v38  ;;  %389 = vmatpush.msra.mxu2 %v320_v40  ;;  %v448_v12 = vld [vmem:[#allocation7 + $0x148] sm:$0xff]  ;;  %v430_v13 = vld [vmem:[#allocation7 + $0xb8] sm:$0xff]  ;;  %v447_v14 = vld [vmem:[#allocation7 + $0x140] sm:$0xff] }
  0x4a   : > { %349 = vmatpush.msra.mxu0 %v288_v41  ;;  %466 = vmatpush.msra.mxu3 %v415_v60  ;;  %v429_v15 = vld [vmem:[#allocation7 + $0xb0] sm:$0xff]  ;;  %v446_v16 = vld [vmem:[#allocation7 + $0x138] sm:$0xff]  ;;  %v428_v17 = vld [vmem:[#allocation7 + $0xa8] sm:$0xff] }
  0x4b   : > { %369 = vmatpush.msra.mxu1 %v304_v42  ;;  %390 = vmatpush.msra.mxu2 %v319_v44  ;;  %v445_v18 = vld [vmem:[#allocation7 + $0x130] sm:$0xff]  ;;  %v412_v19 = vld [vmem:[#allocation7 + $0x28] sm:$0xff]  ;;  %v427_v20 = vld [vmem:[#allocation7 + $0xa0] sm:$0xff] }
  0x4c   : > { %350 = vmatpush.msra.mxu0 %v287_v45  ;;  %467 = vmatpush.msra.mxu3 %v414_v63  ;;  %v444_v21 = vld [vmem:[#allocation7 + $0x128] sm:$0xff]  ;;  %v411_v22 = vld [vmem:[#allocation7 + $0x20] sm:$0xff]  ;;  %v426_v23 = vld [vmem:[#allocation7 + $0x98] sm:$0xff] }
  0x4d   : > { %370 = vmatpush.msra.mxu1 %v303_v46  ;;  %391 = vmatpush.msra.mxu2 %v318_v49  ;;  %v443_v24 = vld [vmem:[#allocation7 + $0x120] sm:$0xff]  ;;  %v410_v25 = vld [vmem:[#allocation7 + $0x18] sm:$0xff]  ;;  %v425_v26 = vld [vmem:[#allocation7 + $0x90] sm:$0xff] }
  0x4e   : > { %351 = vmatpush.msra.mxu0 %v286_v50  ;;  %468 = vmatpush.msra.mxu3 %v413_v2  ;;  %v442_v27 = vld [vmem:[#allocation7 + $0x118] sm:$0xff]  ;;  %v409_v28 = vld [vmem:[#allocation7 + $0x10] sm:$0xff]  ;;  %v424_v29 = vld [vmem:[#allocation7 + $0x88] sm:$0xff] }
  0x4f   : > { %371 = vmatpush.msra.mxu1 %v302_v51  ;;  %392 = vmatpush.msra.mxu2 %v317_v53  ;;  %v441_v30 = vld [vmem:[#allocation7 + $0x110] sm:$0xff]  ;;  %v408_v31 = vld [vmem:[#allocation7 + $0x8] sm:$0xff]  ;;  %v423_v32 = vld [vmem:[#allocation7 + $0x80] sm:$0xff] }
  0x50   : > { %352 = vmatpush.msra.mxu0 %v285_v55  ;;  %640 = vmatmul.msk.f32.vlgmr.msra.gmra.mxu2 %vm283_vm1, %v281_v54  ;;  %v440_v33 = vld [vmem:[#allocation7 + $0x108] sm:$0xff]  ;;  %v407_v34 = vld [vmem:[#allocation7] sm:$0xff]  ;;  %v717_v36 = vld [vmem:[%s1091_s2] ss:$0 sm:$0xff] }
  0x51   : > { %639 = vmatmul.msk.f32.vlgmr.msra.gmra.mxu0 %vm1036_vm2, %v277_v56  ;;  %372 = vmatpush.msra.mxu1 %v301_v58  ;;  %v439_v35 = vld [vmem:[#allocation7 + $0x100] sm:$0xff]  ;;  %v718_v48 = vld [vmem:[%s1093_s4] ss:$0 sm:$0xff] }
  0x52   : > { %479 = vmatpush.msrb.mxu0 %v438_v59  ;;  %373 = vmatmul.f32.vlgmr.msra.gmra.mxu1 %v1032_v47 }
  0x53   : > { %499 = vmatpush.msrb.mxu1 %v454_v62  ;;  %469 = vmatpush.msra.mxu3 %v412_v19 }
  0x54   : > { %480 = vmatpush.msrb.mxu0 %v437_v61 }
  0x55   : > { %500 = vmatpush.msrb.mxu1 %v453_v1  ;;  %470 = vmatpush.msra.mxu3 %v411_v22 }
  0x56   : > { %481 = vmatpush.msrb.mxu0 %v436_v0 }
  0x57   : > { %501 = vmatpush.msrb.mxu1 %v452_v4  ;;  %471 = vmatpush.msra.mxu3 %v410_v25 }
  0x58   : > { %482 = vmatpush.msrb.mxu0 %v435_v3 }
  0x59   : > { %502 = vmatpush.msrb.mxu1 %v451_v6  ;;  %472 = vmatpush.msra.mxu3 %v409_v28 }
  0x5a   : > { %483 = vmatpush.msrb.mxu0 %v434_v5 }
  0x5b   : > { %503 = vmatpush.msrb.mxu1 %v450_v8  ;;  %473 = vmatpush.msra.mxu3 %v408_v31 }
  0x5c   : > { %484 = vmatpush.msrb.mxu0 %v433_v7 }
  0x5d   : > { %504 = vmatpush.msrb.mxu1 %v449_v10  ;;  %474 = vmatpush.msra.mxu3 %v407_v34 }
  0x5e   : > { %485 = vmatpush.msrb.mxu0 %v432_v9 }
  0x5f   : > { %505 = vmatpush.msrb.mxu1 %v448_v12 }
  0x60   : > { %486 = vmatpush.msrb.mxu0 %v431_v11 }
  0x61   : > { %506 = vmatpush.msrb.mxu1 %v447_v14 }
  0x62   : > { %487 = vmatpush.msrb.mxu0 %v430_v13 }
  0x63   : > { %507 = vmatpush.msrb.mxu1 %v446_v16 }
  0x64   : > { %488 = vmatpush.msrb.mxu0 %v429_v15 }
  0x65   : > { %508 = vmatpush.msrb.mxu1 %v445_v18 }
  0x66   : > { %489 = vmatpush.msrb.mxu0 %v428_v17 }
  0x67   : > { %509 = vmatpush.msrb.mxu1 %v444_v21 }
  0x68   : > { %490 = vmatpush.msrb.mxu0 %v427_v20 }
  0x69   : > { %510 = vmatpush.msrb.mxu1 %v443_v24 }
  0x6a   : > { %491 = vmatpush.msrb.mxu0 %v426_v23 }
  0x6b   : > { %511 = vmatpush.msrb.mxu1 %v442_v27 }
  0x6c   : > { %492 = vmatpush.msrb.mxu0 %v425_v26 }
  0x6d   : > { %512 = vmatpush.msrb.mxu1 %v441_v30 }
  0x6e   : > { %493 = vmatpush.msrb.mxu0 %v424_v29 }
  0x6f   : > { %513 = vmatpush.msrb.mxu1 %v440_v33 }
  0x70   : > { %494 = vmatpush.msrb.mxu0 %v423_v32 }
  0x71   : > { %514 = vmatpush.msrb.mxu1 %v439_v35 }
  0xce   : > { %v354_v37 = vpop.f32.mrf.mxu0 }
  0xcf   : > { %v355_v38 = vadd.f32 %v717_v36, %v354_v37  ;;  %v374_v39 = vpop.f32.mrf.mxu1 }
  0xd1   : > { %v375_v40 = vadd.f32 %v374_v39, %v355_v38 }
  0xd3   : > { %v394_v41 = vpop.f32.mrf.mxu2 }
  0xd4   : > { %v395_v42 = vadd.f32 %v394_v41, %v375_v40 }
  0xd6   : > { %v398_v43 = vmul.f32 0.2, %v395_v42  ;;  %vm397_vm3 = vcmp.ge.f32.partialorder %v395_v42, 0.0 }
  0xd8   : > { %v399_v44 = vsel %vm397_vm3, %v395_v42, %v398_v43 }
  0xd9   : > { %v404_v45 = vrot.slane %v399_v44, 1  ;;  %495 = vmatmul.f32.vlgmr.msrb.gmra.mxu0 %v399_v44  ;;  %v401_v46 = vrot.slane %v399_v44, 7 }
  0xdb   : > { %642 = vmatmul.msk.f32.vlgmr.msra.gmra.mxu3 %vm1036_vm2, %v401_v46  ;;  %643 = vmatmul.msk.f32.vlgmr.msrb.gmra.mxu1 %vm283_vm1, %v404_v45 }
 0x156   : > { %v496_v51 = vpop.f32.mrf.mxu0 }
 0x158   : > { %v516_v53 = vpop.f32.mrf.mxu1 }
 0x15e   : > { %v476_v49 = vpop.f32.mrf.mxu3 }
 0x15f   : > { %v477_v50 = vadd.f32 %v718_v48, %v476_v49 }
 0x161   : > { %v497_v52 = vadd.f32 %v496_v51, %v477_v50 }
 0x163   : > { %v517_v54 = vadd.f32 %v516_v53, %v497_v52 }
 0x165   : > { %v519_v55 = vadd.f32 %v517_v54, %v1032_v47 }
 0x167   : > { %520 = vst [vmem:[%s274_s28] sm:$0xff] %v519_v55 }
 0x168   : > { %836 = shalt.err (!%p833_p9)
}
 0x169   : > { %658 = dma.vmem_to_hbm [thread:$0]  (%p984_p4), %s535_s29, 128, %s537_s30, %s522_s25  }
 0x16a PF: > { %s548_s22 = sand.u32 1, %s867_s18   ;;  %p1103_p10 = scmp.ge.s32.totalorder %s879_s21, 2 }
 0x16b   : > { %s549_s9 = scalar_lea.sflag [#allocation4], %s548_s22 }
 0x16c   : > { %p672_p13 = pnand %p1103_p10, %p988_p6 }
 0x16e   : > { %p673_p11 = pneg %p672_p13 }
 0x170   : > { %862 = dma.done.wait (%p673_p11), %s549_s9, 128  }
 0x171   : > { %864 = vsyncadd (%p673_p11), %s549_s9, 4294967168  ;;  %p19_p0 = scmp.ge.s32.totalorder %s958_s12, 4   ;;  %s1104_s18 = smov %s871_s19 }
 0x172   : > { %s1105_s19 = smov %s875_s20  ;;  %s1106_s20 = smov %s969_s15 }
 0x173   : > { %s1107_s21 = smov %s958_s12  ;;  %21 = sbr.rel (!%p19_p0) target bundleno = 6 (0x6), region = 93 }
 0x178   :  { %555 = vsyncpa [#allocation3], 1 }
 0x179   :  { %557 = vsyncpa [#allocation3 + $0x1], 1 }
 0x17a   :  { %558 = vsyncpa [#allocation6], 1 }
 0x17b   :  { %559 = vsyncpa [#allocation4], 1 }
 0x17c   :  { %561 = vsyncpa [#allocation4 + $0x1], 1 }

</bundles_post_ra>
